<compile_context>
chip_gen: v6e
topology: v6e:2x2x1
jax: 0.10.0
libtpu: 0.0.40
codegen_flags: <defaults>
</compile_context>

<pallas_src>
import math

import jax
import jax.numpy as jnp
from jax.experimental import pallas as pl
from jax.experimental.pallas import tpu as pltpu


def _round_up(a: int, b: int) -> int:
    return (a + b - 1) // b * b


# ----------------------------------------------------------------------------- kernels
def _proj_fast_kernel(x_ref, w_ref, o_ref):
    # nk == 1: single K strip, no accumulator round-trip.
    o_ref[...] = jnp.dot(
        x_ref[...], w_ref[...], preferred_element_type=jnp.float32
    ).astype(o_ref.dtype)


def _proj_bias_fast_kernel(x_ref, w_ref, b_ref, o_ref):
    acc = jnp.dot(x_ref[...], w_ref[...], preferred_element_type=jnp.float32)
    o_ref[...] = (acc + b_ref[...]).astype(o_ref.dtype)


def _proj_acc_kernel(x_ref, w_ref, o_ref, acc_ref):
    k = pl.program_id(2)

    @pl.when(k == 0)
    def _():
        acc_ref[...] = jnp.zeros_like(acc_ref)

    acc_ref[...] += jnp.dot(
        x_ref[...], w_ref[...], preferred_element_type=jnp.float32)

    @pl.when(k == pl.num_programs(2) - 1)
    def _():
        o_ref[...] = acc_ref[...].astype(o_ref.dtype)


def _proj_bias_acc_kernel(x_ref, w_ref, b_ref, o_ref, acc_ref):
    k = pl.program_id(2)

    @pl.when(k == 0)
    def _():
        # Bias folded into the accumulator init (no separate epilogue add).
        acc_ref[...] = jnp.broadcast_to(
            b_ref[...], acc_ref.shape).astype(jnp.float32)

    acc_ref[...] += jnp.dot(
        x_ref[...], w_ref[...], preferred_element_type=jnp.float32)

    @pl.when(k == pl.num_programs(2) - 1)
    def _():
        o_ref[...] = acc_ref[...].astype(o_ref.dtype)


# ----------------------------------------------------------------------------- params
def prepare_params(weight, bias=None, *, compute_dtype=jnp.bfloat16, lane=128):
    """One-time parameter setup (NOT the hot path).

    weight: (heads*d_k, d_model)  -- PyTorch nn.Linear layout.
    bias:   (heads*d_k,) or None.
    Returns (w_t, b2d): weight transposed to (d_model, n_pad) in compute_dtype
    (bf16 by default -> MXU-native, half the HBM/VMEM footprint) and bias as a
    float32 (1, n_pad) row, n_pad = round_up(heads*d_k, 128) so w tiles are
    lane-aligned.
    """
    # TODO(synk): optional fp8 weight path for v7x (bf16+fp8 MXU) if accuracy allows.
    n_out, _ = weight.shape
    n_pad = _round_up(n_out, lane)
    w_t = weight.T.astype(compute_dtype)            # done once at setup
    if n_pad != n_out:
        w_t = jnp.pad(w_t, ((0, 0), (0, n_pad - n_out)))
    b2d = None
    if bias is not None:
        b = bias.astype(jnp.float32)
        if n_pad != n_out:
            b = jnp.pad(b, (0, n_pad - n_out))
        b2d = b.reshape(1, n_pad)
    return w_t, b2d


# ----------------------------------------------------------------------------- forward
def prepare_for_multi_head_attention(x, w_t, b2d, heads, d_k,
                                     *, tm: int = 512, tn: int = 512,
                                     tk_max: int = 8192):
    """x: [*head_shape, d_model]; w_t: (d_model, n_pad) pre-transposed bf16
    weight from prepare_params; b2d: (1, n_pad) float32 or None.
    Returns [*head_shape, heads, d_k] in x.dtype."""
    *head_shape, d_model = x.shape
    n_out = heads * d_k
    k_dim, n_pad = w_t.shape
    assert k_dim == d_model and n_pad >= n_out and n_pad % 128 == 0

    compute_dtype = w_t.dtype
    out_dtype = x.dtype
    in_b = jnp.dtype(compute_dtype).itemsize
    out_b = jnp.dtype(out_dtype).itemsize

    m = math.prod(head_shape) if head_shape else 1
    # Cast activations to the MXU-native compute dtype (review: bf16 operands,
    # f32 accumulation).  In a fused pipeline x would typically already be bf16.
    x2d = x.reshape(m, d_model).astype(compute_dtype)

    # --- tile sizes -----------------------------------------------------------
    tm = m if m <= tm else (tm // 8) * 8                       # mult of 8 (or full M)
    tn = n_pad if n_pad <= tn else (tn // 128) * 128           # mult of 128 (or full N)
    if d_model <= tk_max:
        tk, k_pad = d_model, d_model                           # nk == 1 fast path
    else:
        # Rare path: huge d_model.  Use a 128-aligned tk that exactly divides a
        # (possibly zero-padded) K so partial K blocks never feed garbage into
        # the reduction.
        tk_cap = max(128, (tk_max // 128) * 128)
        k_pad = _round_up(d_model, 128)
        tk = 128
        for cand in range(tk_cap, 127, -128):
            if k_pad % cand == 0:
                tk = cand
                break
        if k_pad != d_model:
            # TODO(synk): this K zero-pad is an extra HBM pass; only hit when
            # d_model > tk_max and d_model % 128 != 0.
            x2d = jnp.pad(x2d, ((0, 0), (0, k_pad - d_model)))
            w_t = jnp.pad(w_t, ((0, k_pad - d_model), (0, 0)))

    ni = pl.cdiv(m, tm)
    nj = pl.cdiv(n_pad, tn)
    nk = pl.cdiv(k_pad, tk)

    # --- grid order: minimize HBM re-streaming, keep v7x's 2 TCs busy ---------
    x_bytes = m * k_pad * in_b
    w_bytes = k_pad * n_pad * in_b
    reread_j_outer = (nj - 1) * x_bytes + ((ni - 1) * w_bytes if nk > 1 else 0)
    reread_i_outer = (ni - 1) * w_bytes + ((nj - 1) * x_bytes if nk > 1 else 0)
    j_outer = reread_j_outer <= reread_i_outer
    base_bytes = x_bytes + w_bytes
    # Avoid a size-1 outermost parallel axis (v7x megacore) when the swap costs
    # at most one extra full pass over the operands.
    if j_outer and nj == 1 and ni >= 2 and reread_i_outer <= base_bytes:
        j_outer = False
    elif (not j_outer) and ni == 1 and nj >= 2 and reread_j_outer <= base_bytes:
        j_outer = True

    if nk == 1:
        if j_outer:
            grid = (nj, ni)
            x_map = lambda j, i: (i, 0)
            w_map = lambda j, i: (0, j)
            b_map = lambda j, i: (0, j)
            o_map = lambda j, i: (i, j)
        else:
            grid = (ni, nj)
            x_map = lambda i, j: (i, 0)
            w_map = lambda i, j: (0, j)
            b_map = lambda i, j: (0, j)
            o_map = lambda i, j: (i, j)
        dims = ("parallel", "parallel")
        scratch = []
        kernel = _proj_fast_kernel if b2d is None else _proj_bias_fast_kernel
    else:
        if j_outer:
            grid = (nj, ni, nk)
            x_map = lambda j, i, k: (i, k)
            w_map = lambda j, i, k: (k, j)
            b_map = lambda j, i, k: (0, j)
            o_map = lambda j, i, k: (i, j)
        else:
            grid = (ni, nj, nk)
            x_map = lambda i, j, k: (i, k)
            w_map = lambda i, j, k: (k, j)
            b_map = lambda i, j, k: (0, j)
            o_map = lambda i, j, k: (i, j)
        dims = ("parallel", "parallel", "arbitrary")
        scratch = [pltpu.VMEM((tm, tn), jnp.float32)]
        kernel = _proj_acc_kernel if b2d is None else _proj_bias_acc_kernel

    # --- explicit scoped-VMEM budget: double-buffered tiles + accumulator -----
    work = 2 * (tm * tk * in_b + tk * tn * in_b + tn * 4) + 2 * tm * tn * out_b
    if nk > 1:
        work += tm * tn * 4
    vmem_limit = max(32 << 20, min(int(work * 1.25), 100 << 20))

    in_specs = [pl.BlockSpec((tm, tk), x_map),
                pl.BlockSpec((tk, tn), w_map)]
    operands = [x2d, w_t]
    if b2d is not None:
        in_specs.append(pl.BlockSpec((1, tn), b_map))
        operands.append(b2d)

    # Output is written at its true width n_out: only the last N tile is a
    # masked store (no pad-then-slice extra HBM pass).
    y2d = pl.pallas_call(
        kernel,
        out_shape=jax.ShapeDtypeStruct((m, n_out), out_dtype),
        grid_spec=pltpu.PrefetchScalarGridSpec(
            num_scalar_prefetch=0,
            grid=grid,
            in_specs=in_specs,
            out_specs=pl.BlockSpec((tm, tn), o_map),
            scratch_shapes=scratch),
        compiler_params=pltpu.CompilerParams(
            dimension_semantics=dims,
            vmem_limit_bytes=vmem_limit),
    )(*operands)

    return y2d.reshape(*head_shape, heads, d_k)


# ----------------------------------------------------------------------------- demo
if __name__ == "__main__":
    # Small shapes consistent with the module's forward:
    # x is [seq, batch, d_model] (labml MHA convention).
    seq, batch, d_model = 8, 2, 32
    heads, d_k = 4, 16

    key = jax.random.PRNGKey(0)
    kx, kw, kb = jax.random.split(key, 3)

    # nn.Linear-style init: U(-1/sqrt(fan_in), 1/sqrt(fan_in)).
    bound = 1.0 / math.sqrt(d_model)
    weight = jax.random.uniform(
        kw, (heads * d_k, d_model), jnp.float32, -bound, bound)
    bias = jax.random.uniform(kb, (heads * d_k,), jnp.float32, -bound, bound)

    x = jax.random.normal(kx, (seq, batch, d_model), jnp.float32)

    # Reference with the same bf16-rounded operands (kernel accumulates in f32).
    x_r = x.astype(jnp.bfloat16).astype(jnp.float32)
    w_r = weight.astype(jnp.bfloat16).astype(jnp.float32)

    # --- with bias ---
    w_t, b2d = prepare_params(weight, bias)
    y = prepare_for_multi_head_attention(x, w_t, b2d, heads, d_k)
    y = jax.block_until_ready(y)
    y_ref = (x_r.reshape(-1, d_model) @ w_r.T + bias).reshape(
        seq, batch, heads, d_k)
    assert y.shape == (seq, batch, heads, d_k)
    assert jnp.allclose(y, y_ref, atol=2e-3, rtol=2e-3)

    # --- without bias (exercises the no-bias kernel) ---
    w_t2, _ = prepare_params(weight, None)
    y2 = prepare_for_multi_head_attention(x, w_t2, None, heads, d_k)
    y2 = jax.block_until_ready(y2)
    y2_ref = (x_r.reshape(-1, d_model) @ w_r.T).reshape(seq, batch, heads, d_k)
    assert jnp.allclose(y2, y2_ref, atol=2e-3, rtol=2e-3)

    print("KERNEL_OK")
</pallas_src>

<mosaic_0001>
module attributes {stable_mosaic.version = 11 : i64} {
  func.func @_proj_bias_fast_kernel(%arg0: i32, %arg1: i32, %arg2: memref<16x32xbf16, #tpu.memory_space<vmem>>, %arg3: memref<32x128xbf16, #tpu.memory_space<vmem>>, %arg4: memref<1x128xf32, #tpu.memory_space<vmem>>, %arg5: memref<16x128xf32, #tpu.memory_space<vmem>>) attributes {dimension_semantics = [#tpu.dimension_semantics<parallel>, #tpu.dimension_semantics<parallel>], iteration_bounds = array<i64: 1, 1>, scalar_prefetch = 0 : i64, scratch_operands = 0 : i64, tpu.core_type = #tpu.core_type<tc>, window_params = [{transform_indices = @transform_0, window_bounds = array<i64: 16, 32>}, {transform_indices = @transform_1, window_bounds = array<i64: 32, 128>}, {transform_indices = @transform_2, window_bounds = array<i64: 1, 128>}, {transform_indices = @transform_3, window_bounds = array<i64: 16, 128>}]} {
    %c0 = arith.constant 0 : index
    %c0_0 = arith.constant 0 : index
    %0 = vector.load %arg2[%c0, %c0_0] : memref<16x32xbf16, #tpu.memory_space<vmem>>, vector<16x32xbf16>
    %c0_1 = arith.constant 0 : index
    %c0_2 = arith.constant 0 : index
    %1 = vector.load %arg3[%c0_1, %c0_2] : memref<32x128xbf16, #tpu.memory_space<vmem>>, vector<32x128xbf16>
    %cst = arith.constant dense<0.000000e+00> : vector<16x128xf32>
    %2 = tpu.matmul %0, %1, %cst {dimension_numbers = #tpu.dot_dimension_numbers<[1], [0], [0], [1], [0, 0, 1, 1], [], []>} : vector<16x32xbf16>, vector<32x128xbf16>, vector<16x128xf32> -> vector<16x128xf32>
    %c0_3 = arith.constant 0 : index
    %c0_4 = arith.constant 0 : index
    %3 = vector.load %arg4[%c0_3, %c0_4] : memref<1x128xf32, #tpu.memory_space<vmem>>, vector<1x128xf32>
    %4 = vector.broadcast %3 : vector<1x128xf32> to vector<16x128xf32>
    %5 = arith.addf %2, %4 : vector<16x128xf32>
    %c0_5 = arith.constant 0 : index
    %c0_6 = arith.constant 0 : index
    %6 = vector.load %arg5[%c0_5, %c0_6] : memref<16x128xf32, #tpu.memory_space<vmem>>, vector<16x128xf32>
    tpu.vector_store %arg5[%c0_5, %c0_6], %5 {strides = array<i32>} : memref<16x128xf32, #tpu.memory_space<vmem>>, vector<16x128xf32>,
    return
  }
  func.func @transform_0(%arg0: i32, %arg1: i32) -> (i32, i32) {
    %c0_i32 = arith.constant 0 : i32
    %c0_i32_0 = arith.constant 0 : i32
    return %arg1, %c0_i32 : i32, i32
  }
  func.func @transform_1(%arg0: i32, %arg1: i32) -> (i32, i32) {
    %c0_i32 = arith.constant 0 : i32
    %c0_i32_0 = arith.constant 0 : i32
    return %c0_i32, %arg0 : i32, i32
  }
  func.func @transform_2(%arg0: i32, %arg1: i32) -> (i32, i32) {
    %c0_i32 = arith.constant 0 : i32
    %c0_i32_0 = arith.constant 0 : i32
    return %c0_i32, %arg0 : i32, i32
  }
  func.func @transform_3(%arg0: i32, %arg1: i32) -> (i32, i32) {
    %c0_i32 = arith.constant 0 : i32
    return %arg1, %arg0 : i32, i32
  }
}

</mosaic_0001>

<bundles_post_ra>
// kernel: tpu_custom_call.1
= control target key start
LH: loop header
LB: loop body
LE: loop exit
PB: predicated region body
PF: predicated region fallthrough
CT: control target
= control target key end

     0   :  { %8 = vsyncpa [#allocation3], 0  ;;  %s274_s0 = inlined_call_operand.hbm [shape: bf16[16,32], index: 0, kind: input, shape index: {}]   ;;  %s275_s1 = inlined_call_operand.hbm [shape: bf16[32,128], index: 1, kind: input, shape index: {}]   ;;  %s276_s2 = inlined_call_operand.vmem [shape: f32[1,128], index: 2, kind: input, shape index: {}]   ;;  %s277_s3 = inlined_call_operand.hbm [shape: f32[16,64], index: 3, kind: output, shape index: {}]  }
   0x1   :  { %9 = vsyncpa [#allocation6], 0 }
   0x2   :  { %10 = vsyncpa [#allocation4], 0  ;;  %s233_s12 = smov [#allocation2]  }
   0x3   :  { %s16_s13 = sshll.u32 %s233_s12, 4  ;;  %s17_s13 = int_to_ptr.vmem [resolvable:$true] %s16_s13 }
   0x4   :  { %s175_s14 = scalar_lea.vmem %s17_s13, 128  ;;  %p180_p1 = scmp.lt.s32.totalorder %s17_s13, %s17_s13 }
   0x5   :  { %p176_p0 = scmp.ne.s32.totalorder %s17_s13, %s175_s14  ;;  %p181_p2 = scmp.lt.s32.totalorder %s175_s14, %s175_s14 }
   0x7   :  { %p182_p3 = por %p181_p2, %p180_p1 }
   0x9   :  { %p183_p4 = pnand %p182_p3, %p176_p0 }
   0xb   :  { %186 = shalt.err (!%p183_p4)
}
   0xc   :  { %s234_s15 = smov 64   ;;  %s235_s16 = smov 4  }
   0xd   :  { %22 = dma.hbm_to_vmem [thread:$0]  %s274_s0, 128, %s17_s13, [#allocation3], %s234_s15, %s234_s15, %s235_s16  }
   0xe   :  { %s236_s19 = smov [#allocation5]  }
   0xf   :  { %s28_s20 = sshll.u32 %s236_s19, 4  ;;  %s29_s20 = int_to_ptr.vmem [resolvable:$true] %s28_s20 }
  0x10   :  { %s195_s21 = scalar_lea.vmem %s29_s20, 256  ;;  %p200_p6 = scmp.lt.s32.totalorder %s29_s20, %s29_s20 }
  0x11   :  { %p196_p5 = scmp.ne.s32.totalorder %s29_s20, %s195_s21  ;;  %p201_p7 = scmp.lt.s32.totalorder %s195_s21, %s195_s21 }
  0x13   :  { %p202_p8 = por %p201_p7, %p200_p6 }
  0x15   :  { %p203_p9 = pnand %p202_p8, %p196_p5 }
  0x17   :  { %206 = shalt.err (!%p203_p9)
}
  0x18   :  { %34 = dma.hbm_to_vmem [thread:$0]  %s275_s1, 256, %s29_s20, [#allocation6], %s234_s15, %s234_s15, %s235_s16  }
  0x19   :  { %227 = dma.done.wait [#allocation3], 128  }
  0x1a   :  { %228 = vsyncadd [#allocation3], 4294967168 }
  0x1b   :  { %229 = dma.done.wait [#allocation6], 256  }
  0x1c   :  { %230 = vsyncadd [#allocation6], 4294967040  ;;  %v237_v0 = vmov 0.0   ;;  %vm238_vm0 = vmmov 0   ;;  %v164_v1 = vld [vmem:[#allocation5 + $0x8] sm:$0xff]   ;;  %v165_v2 = vld [vmem:[#allocation5] sm:$0xff]  }
  0x1d   :  { %147 = vmatprep.subr.bf16.mxu0 %v237_v0  ;;  %151 = vmatprep.mubr.msk.bf16.mxu0 %vm238_vm0, %v237_v0  ;;  %v166_v3 = vld [vmem:[#allocation2] sm:$0xff]   ;;  %vm74_vm1 = vcmask 261120   ;;  %s239_s1 = smov [#allocation7]  }
  0x1e   :  { %148 = vmatpush3.bf16.msra.mxu0 %v164_v1  ;;  %v139_v4 = vld [vmem:[%s276_s2] ss:$0 sm:$0xff]  ;;  %s126_s25 = sshll.u32 %s239_s1, 4  ;;  %s127_s25 = int_to_ptr.vmem [resolvable:$true] %s126_s25 }
  0x1f   :  { %149 = vmatprep.subr.bf16.mxu0 %v237_v0  ;;  %s207_s26 = scalar_lea.vmem %s127_s25, 256  ;;  %p212_p11 = scmp.lt.s32.totalorder %s127_s25, %s127_s25 }
  0x20   :  { %p208_p10 = scmp.ne.s32.totalorder %s127_s25, %s207_s26  ;;  %p213_p12 = scmp.lt.s32.totalorder %s207_s26, %s207_s26 }
  0x22   :  { %150 = vmatpush3.bf16.msra.mxu0 %v165_v2  ;;  %p214_p13 = por %p213_p12, %p212_p11 }
  0x24   :  { %p215_p0 = pnand %p214_p13, %p208_p10 }
  0x25   :  { %152 = vmatmul.mubr.msk.bf16.vlgmr.msra.gmra.mxu0 %vm74_vm1, %v166_v3 }
  0xe5   :  { %v112_v5 = vpop.f32.mrf.mxu0 }
  0xe6   :  { %v113_v6 = vadd.f32 %v139_v4, %v112_v5 }
  0xe7   :  { %v153_v7 = vpop.f32.mrf.mxu0 }
  0xe8   :  { %119 = vst [vmem:[#allocation7] sm:$0xff] %v113_v6 }
  0xe9   :  { %v115_v8 = vpop.f32.mrf.mxu0 }
  0xea   :  { %v116_v9 = vadd.f32 %v139_v4, %v115_v8 }
  0xeb   :  { %v154_v10 = vpop.f32.mrf.mxu0 }
  0xec   :  { %120 = vst [vmem:[#allocation7 + $0x8] sm:$0xff] %v116_v9 }
  0xed   :  { %218 = shalt.err (!%p215_p0)
}
  0xee   :  { %s240_s27 = smov 128   ;;  %s241_s2 = smov 8  }
  0xef   :  { %132 = dma.vmem_to_hbm [thread:$0]  %s127_s25, 256, %s277_s3, [#allocation4], %s240_s27, %s240_s27, %s241_s2  }
  0xf0   :  { %231 = dma.done.wait [#allocation4], 256  }
  0xf1   :  { %232 = vsyncadd [#allocation4], 4294967040 }
  0xf2   :  { %136 = vsyncpa [#allocation3], 1 }
  0xf3   :  { %137 = vsyncpa [#allocation6], 1 }
  0xf4   :  { %138 = vsyncpa [#allocation4], 1 }

</bundles_post_ra>
